<compile_context>
chip_gen: v7x
topology: tpu7x:2x2x1
jax: 0.10.0
libtpu: 0.0.40
codegen_flags: <defaults>
</compile_context>

<pallas_src>
import functools

import jax
import jax.numpy as jnp
from jax import lax
from jax.experimental import pallas as pl
from jax.experimental.pallas import tpu as pltpu


# MXU operand dtype. bf16 doubles MXU throughput and halves operand bytes on
# v6e/v7x; set to jnp.float32 for bit-closer-to-reference numerics.
_MXU_DTYPE = jnp.bfloat16


def gnn_policy_kernel(
    x_ref, ef_ref, src_ref, dst_ref, pool_ref, invdeg_ref,
    w_src_ref, w_edge_ref, b_msg_ref,
    w_self_ref, w_agg_ref, b_node_ref,
    out_ref,
    *, mxu_dtype,
):
    BN = x_ref.shape[0]          # Bt * N   node rows in this block
    BE = ef_ref.shape[0]         # Bt * E   edge rows in this block
    cdt = mxu_dtype
    f32 = jnp.float32

    x = x_ref[...]               # (BN, Fn) bf16
    ef = ef_ref[...]             # (BE, Fe) bf16
    src_col = src_ref[...]       # (BE, 1) int32, -1 for padded edges
    dst_row = dst_ref[...]       # (1, BE) int32, -1 for padded edges

    # --- reassociated source gather: xw over node rows, then one-hot gather --
    xw = jnp.dot(x, w_src_ref[...], preferred_element_type=f32)         # (BN, H)
    col_iota = lax.broadcasted_iota(jnp.int32, (BE, BN), 1)
    s_oh = (col_iota == src_col).astype(cdt)                            # (BE, BN) bf16
    src_term = jnp.dot(s_oh, xw.astype(cdt),
                       preferred_element_type=f32)                      # (BE, H)

    # --- edge messages: relu(x_src @ W_src + ef @ W_edge + b) ----------------
    msg = jnp.maximum(
        src_term
        + jnp.dot(ef, w_edge_ref[...], preferred_element_type=f32)
        + b_msg_ref[...],
        0.0,
    )                                                                   # (BE, H) f32

    # --- mean-aggregate incoming messages at destination nodes ---------------
    # d_t built once, directly in bf16; in-degree reciprocal precomputed
    # exactly in the wrapper (no f32 one-hot, no cross-lane reduce).
    row_iota = lax.broadcasted_iota(jnp.int32, (BN, BE), 0)
    d_t = (row_iota == dst_row).astype(cdt)                             # (BN, BE) bf16
    agg = jnp.dot(d_t, msg.astype(cdt), preferred_element_type=f32)     # (BN, H)
    agg = agg * invdeg_ref[...]                                         # exact mean

    # --- node update: relu(x @ W_self + agg @ W_agg + b) ---------------------
    h = jnp.maximum(
        jnp.dot(x, w_self_ref[...], preferred_element_type=f32)
        + jnp.dot(agg.astype(cdt), w_agg_ref[...], preferred_element_type=f32)
        + b_node_ref[...],
        0.0,
    )                                                                   # (BN, Fo) f32

    # --- per-graph masked SUM over valid nodes (mask folded into the pool) ---
    # Division by n_split and the logit-MLP tail happen in the wrapper.
    out_ref[...] = jnp.dot(pool_ref[...], h.astype(cdt),
                           preferred_element_type=f32).astype(out_ref.dtype)


def _spec3(rows, cols):
    """Per-block data spec: (G, rows, cols) array, squeezed leading grid dim.
    Last two block dims equal the full array dims -> always (8,128)-legal."""
    return pl.BlockSpec((None, rows, cols), lambda g: (g, 0, 0))


def _replicated_spec(shape):
    zeros = (0,) * len(shape)
    return pl.BlockSpec(shape, lambda g, _z=zeros: _z)


def _pick_block_graphs(B, N, E, target_rows=256):
    """Pick graphs-per-block Bt (divisor of B):
      * Bt*max(N,E) <= target_rows (one MXU pass; one-hot cost grows ~Bt^2)
      * prefer G = B//Bt >= 2 so the 'parallel' axis spans both v7x TCs
      * prefer 8-aligned Bt*N / Bt*E row counts when available."""
    cands = [bt for bt in range(1, B + 1) if B % bt == 0]
    aligned = [bt for bt in cands if (bt * N) % 8 == 0 and (bt * E) % 8 == 0]
    pool = aligned if aligned else cands
    rows = lambda bt: bt * max(N, E)
    fits_multi = [bt for bt in pool if rows(bt) <= target_rows and B // bt >= 2]
    if fits_multi:
        return max(fits_multi, key=rows)
    fits = [bt for bt in pool if rows(bt) <= target_rows]
    if fits:
        return max(fits, key=rows)
    return min(pool, key=rows)


@jax.jit
def gnn_policy_forward(
    node_features, edge_features, src, dst, graph_features,
    node_split, edge_split, params,
):
    f32 = jnp.float32
    B, N, Fn = node_features.shape
    E, Fe = edge_features.shape[1], edge_features.shape[2]
    Fo = params["w_self"].shape[1]

    Bt = _pick_block_graphs(B, N, E)
    G = B // Bt

    # ---- wrapper-side layout plumbing & cheap exact precompute (XLA) ----
    node3 = node_features.astype(_MXU_DTYPE).reshape(G, Bt * N, Fn)
    edge3 = edge_features.astype(_MXU_DTYPE).reshape(G, Bt * E, Fe)

    src_i = src.astype(jnp.int32)
    dst_i = dst.astype(jnp.int32)
    e_iota = jnp.arange(E, dtype=jnp.int32)[None, :]
    edge_valid = e_iota < edge_split.astype(jnp.int32)[:, None]          # (B, E)
    g_local = (jnp.arange(B, dtype=jnp.int32) % Bt)[:, None]             # (B, 1)
    src3 = jnp.where(edge_valid, src_i + g_local * N, -1).reshape(G, Bt * E, 1)
    dst3 = jnp.where(edge_valid, dst_i + g_local * N, -1).reshape(G, 1, Bt * E)

    # Exact per-node in-degree reciprocal (isolated/padded nodes -> /1).
    b_idx = jnp.arange(B, dtype=jnp.int32)[:, None]
    deg = jnp.zeros((B, N), f32).at[b_idx, dst_i].add(edge_valid.astype(f32))
    invdeg3 = (1.0 / jnp.maximum(deg, 1.0)).reshape(G, Bt * N, 1)

    # Pooling one-hot with node-validity folded in (0/1 -> exact in bf16).
    j = jnp.arange(Bt * N, dtype=jnp.int32)[None, :]
    nsplit_i = node_split.astype(jnp.int32)[:, None]
    pool = ((j // N == g_local) & ((j % N) < nsplit_i)).astype(_MXU_DTYPE)
    pool3 = pool.reshape(G, Bt, Bt * N)

    mat = lambda k: params[k].astype(_MXU_DTYPE)
    vec = lambda k: params[k].astype(f32)
    weights = [mat("w_src"), mat("w_edge"), vec("b_msg"),
               mat("w_self"), mat("w_agg"), vec("b_node")]

    data_specs = [
        _spec3(Bt * N, Fn),     # node features
        _spec3(Bt * E, Fe),     # edge features
        _spec3(Bt * E, 1),      # src columns (block-global ids)
        _spec3(1, Bt * E),      # dst columns (lane-major row)
        _spec3(Bt, Bt * N),     # masked pooling one-hot
        _spec3(Bt * N, 1),      # 1 / in-degree
    ]

    grid_spec = pltpu.PrefetchScalarGridSpec(
        num_scalar_prefetch=0,
        grid=(G,),
        in_specs=data_specs + [_replicated_spec(w.shape) for w in weights],
        out_specs=_spec3(Bt, Fo),
    )

    kernel = functools.partial(gnn_policy_kernel, mxu_dtype=_MXU_DTYPE)

    emb_sum = pl.pallas_call(
        kernel,
        out_shape=jax.ShapeDtypeStruct((G, Bt, Fo), f32),
        grid_spec=grid_spec,
        compiler_params=pltpu.CompilerParams(
            dimension_semantics=("parallel",),
            vmem_limit_bytes=32 * 1024 * 1024,   # safe within v7x's 64 MiB physical
        ),
    )(node3, edge3, src3, dst3, pool3, invdeg3, *weights).reshape(B, Fo)

    # ---- tiny tail in plain XLA over all B rows (exact f32) ----
    emb_nodes = emb_sum / jnp.maximum(node_split.astype(f32), 1.0)[:, None]
    emb_graph = graph_features.astype(f32) @ vec("w_g") + vec("b_g")
    h1 = jnp.tanh(emb_nodes @ vec("w1n") + emb_graph @ vec("w1g") + vec("b1"))
    h2 = jnp.tanh(h1 @ vec("w2") + vec("b2"))
    return h2 @ vec("w3") + vec("b3")


def init_params(key, Fn, Fe, H, Fo, Gin, Gout, Hm, A):
    ks = jax.random.split(key, 16)
    n = lambda k, s: (0.1 * jax.random.normal(k, s, jnp.float32))
    return {
        # GNN (synthetic message-passing layer)
        "w_src": n(ks[0], (Fn, H)),
        "w_edge": n(ks[1], (Fe, H)),
        "b_msg": n(ks[2], (1, H)),
        "w_self": n(ks[3], (Fn, Fo)),
        "w_agg": n(ks[4], (H, Fo)),
        "b_node": n(ks[5], (1, Fo)),
        # graph_layer: Linear(in_features_graph -> out_features_graph)
        "w_g": n(ks[6], (Gin, Gout)),
        "b_g": n(ks[7], (1, Gout)),
        # logit_layer: 2-hidden-layer FC on concat(emb_nodes, emb_graph) -> A
        "w1n": n(ks[8], (Fo, Hm)),    # first-layer weight rows for emb_nodes
        "w1g": n(ks[9], (Gout, Hm)),  # first-layer weight rows for emb_graph
        "b1": n(ks[10], (1, Hm)),
        "w2": n(ks[11], (Hm, Hm)),
        "b2": n(ks[12], (1, Hm)),
        "w3": n(ks[13], (Hm, A)),
        "b3": n(ks[14], (1, A)),
    }


def reference_forward(node_features, edge_features, src, dst, graph_features,
                      node_split, edge_split, params):
    """Pure-JAX f32 reference mirroring the per-graph torch loop."""
    B = node_features.shape[0]
    embs = []
    for b in range(B):
        ns = int(node_split[b])
        es = int(edge_split[b])
        x = node_features[b, :ns]
        ef = edge_features[b, :es]
        s = src[b, :es]
        d = dst[b, :es]
        msg = jax.nn.relu(x[s] @ params["w_src"] + ef @ params["w_edge"]
                          + params["b_msg"])
        agg = jnp.zeros((ns, msg.shape[1]), jnp.float32).at[d].add(msg)
        deg = jnp.zeros((ns,), jnp.float32).at[d].add(1.0)
        agg = agg / jnp.maximum(deg, 1.0)[:, None]
        h = jax.nn.relu(x @ params["w_self"] + agg @ params["w_agg"]
                        + params["b_node"])
        embs.append(jnp.mean(h, axis=0))
    emb_nodes = jnp.stack(embs)
    emb_graph = graph_features @ params["w_g"] + params["b_g"]
    h1 = jnp.tanh(emb_nodes @ params["w1n"] + emb_graph @ params["w1g"]
                  + params["b1"])
    h2 = jnp.tanh(h1 @ params["w2"] + params["b2"])
    return h2 @ params["w3"] + params["b3"]


if __name__ == "__main__":
    # Small config (mirrors config['in_features_graph'], ['out_features_graph'],
    # ['out_features'] etc.)
    B, N, E = 2, 8, 16
    Fn, Fe = 8, 4          # node / edge feature dims
    H = 16                 # GNN message hidden dim
    Fo = 32                # config['out_features']  (GNN node-embedding dim)
    Gin, Gout = 8, 16      # config['in_features_graph'] / ['out_features_graph']
    Hm, A = 32, 2          # logit FC hidden size / num_outputs

    key = jax.random.PRNGKey(0)
    kp, k0, k1, k2, k3, k4 = jax.random.split(key, 6)

    params = init_params(kp, Fn, Fe, H, Fo, Gin, Gout, Hm, A)

    node_split = jnp.array([6, 8], dtype=jnp.int32)
    edge_split = jnp.array([10, 16], dtype=jnp.int32)

    node_features = jax.random.normal(k0, (B, N, Fn), jnp.float32)
    edge_features = jax.random.normal(k1, (B, E, Fe), jnp.float32)
    # src/dst node ids constrained to valid (un-padded) node range per graph.
    src = (jax.random.randint(k2, (B, E), 0, N, jnp.int32) % node_split[:, None]).astype(jnp.int32)
    dst = (jax.random.randint(k3, (B, E), 0, N, jnp.int32) % node_split[:, None]).astype(jnp.int32)
    graph_features = jax.random.normal(k4, (B, Gin), jnp.float32)

    logits = gnn_policy_forward(
        node_features, edge_features, src, dst, graph_features,
        node_split, edge_split, params,
    )
    jax.block_until_ready(logits)
    assert logits.shape == (B, A) and logits.dtype == jnp.float32
    assert bool(jnp.all(jnp.isfinite(logits)))

    ref = reference_forward(node_features, edge_features, src, dst,
                            graph_features, node_split, edge_split, params)
    assert float(jnp.max(jnp.abs(logits - ref))) < 5e-2  # bf16 MXU tolerance

    print("KERNEL_OK")
</pallas_src>

<mosaic_0001>
module attributes {stable_mosaic.version = 11 : i64} {
  func.func private @main(%arg0: i32) attributes {dimension_semantics = [#tpu.dimension_semantics<core_parallel>], iteration_bounds = array<i64: 2>, tpu.core_type = #tpu.core_type<sc_scalar_subcore>, window_params = []} {
    return
  }
}

module attributes {stable_mosaic.version = 11 : i64} {
  func.func private @main(%arg0: i32) attributes {dimension_semantics = [#tpu.dimension_semantics<core_parallel>], iteration_bounds = array<i64: 2>, tpu.core_type = #tpu.core_type<sc_scalar_subcore>, window_params = []} {
    return
  }
}

module attributes {stable_mosaic.version = 11 : i64} {
  func.func @gnn_policy_kernel(%arg0: i32, %arg1: memref<1x8x8xbf16, #tpu.memory_space<vmem>>, %arg2: memref<1x16x4xbf16, #tpu.memory_space<vmem>>, %arg3: memref<1x16x1xi32, #tpu.memory_space<vmem>>, %arg4: memref<1x1x16xi32, #tpu.memory_space<vmem>>, %arg5: memref<1x1x8xbf16, #tpu.memory_space<vmem>>, %arg6: memref<1x8x1xf32, #tpu.memory_space<vmem>>, %arg7: memref<8x16xbf16, #tpu.memory_space<vmem>>, %arg8: memref<4x16xbf16, #tpu.memory_space<vmem>>, %arg9: memref<1x16xf32, #tpu.memory_space<vmem>>, %arg10: memref<8x32xbf16, #tpu.memory_space<vmem>>, %arg11: memref<16x32xbf16, #tpu.memory_space<vmem>>, %arg12: memref<1x32xf32, #tpu.memory_space<vmem>>, %arg13: memref<1x1x32xf32, #tpu.memory_space<vmem>>) attributes {dimension_semantics = [#tpu.dimension_semantics<parallel>], iteration_bounds = array<i64: 2>, scalar_prefetch = 0 : i64, scratch_operands = 0 : i64, tpu.core_type = #tpu.core_type<tc>, window_params = [{transform_indices = @transform_0, window_bounds = array<i64: 1, 8, 8>}, {transform_indices = @transform_1, window_bounds = array<i64: 1, 16, 4>}, {transform_indices = @transform_2, window_bounds = array<i64: 1, 16, 1>}, {transform_indices = @transform_3, window_bounds = array<i64: 1, 1, 16>}, {transform_indices = @transform_4, window_bounds = array<i64: 1, 1, 8>}, {transform_indices = @transform_5, window_bounds = array<i64: 1, 8, 1>}, {pipeline_mode = #tpu.pipeline_mode<synchronous>, transform_indices = @transform_6, window_bounds = array<i64: 8, 16>}, {pipeline_mode = #tpu.pipeline_mode<synchronous>, transform_indices = @transform_7, window_bounds = array<i64: 4, 16>}, {pipeline_mode = #tpu.pipeline_mode<synchronous>, transform_indices = @transform_8, window_bounds = array<i64: 1, 16>}, {pipeline_mode = #tpu.pipeline_mode<synchronous>, transform_indices = @transform_9, window_bounds = array<i64: 8, 32>}, {pipeline_mode = #tpu.pipeline_mode<synchronous>, transform_indices = @transform_10, window_bounds = array<i64: 16, 32>}, {pipeline_mode = #tpu.pipeline_mode<synchronous>, transform_indices = @transform_11, window_bounds = array<i64: 1, 32>}, {transform_indices = @transform_12, window_bounds = array<i64: 1, 1, 32>}]} {
    %c0 = arith.constant 0 : index
    %c0_0 = arith.constant 0 : index
    %c0_1 = arith.constant 0 : index
    %0 = vector.load %arg1[%c0, %c0_0, %c0_1] : memref<1x8x8xbf16, #tpu.memory_space<vmem>>, vector<1x8x8xbf16>
    %1 = vector.shape_cast %0 : vector<1x8x8xbf16> to vector<8x8xbf16>
    %c0_2 = arith.constant 0 : index
    %c0_3 = arith.constant 0 : index
    %c0_4 = arith.constant 0 : index
    %2 = vector.load %arg2[%c0_2, %c0_3, %c0_4] : memref<1x16x4xbf16, #tpu.memory_space<vmem>>, vector<1x16x4xbf16>
    %3 = vector.shape_cast %2 : vector<1x16x4xbf16> to vector<16x4xbf16>
    %c0_5 = arith.constant 0 : index
    %c0_6 = arith.constant 0 : index
    %c0_7 = arith.constant 0 : index
    %4 = vector.load %arg3[%c0_5, %c0_6, %c0_7] : memref<1x16x1xi32, #tpu.memory_space<vmem>>, vector<1x16x1xi32>
    %5 = vector.shape_cast %4 : vector<1x16x1xi32> to vector<16x1xi32>
    %c0_8 = arith.constant 0 : index
    %c0_9 = arith.constant 0 : index
    %c0_10 = arith.constant 0 : index
    %6 = vector.load %arg4[%c0_8, %c0_9, %c0_10] : memref<1x1x16xi32, #tpu.memory_space<vmem>>, vector<1x1x16xi32>
    %7 = vector.shape_cast %6 : vector<1x1x16xi32> to vector<1x16xi32>
    %c0_11 = arith.constant 0 : index
    %c0_12 = arith.constant 0 : index
    %8 = vector.load %arg7[%c0_11, %c0_12] : memref<8x16xbf16, #tpu.memory_space<vmem>>, vector<8x16xbf16>
    %cst = arith.constant dense<0.000000e+00> : vector<8x16xf32>
    %9 = tpu.matmul %1, %8, %cst {dimension_numbers = #tpu.dot_dimension_numbers<[1], [0], [0], [1], [0, 0, 1, 1], [], []>} : vector<8x8xbf16>, vector<8x16xbf16>, vector<8x16xf32> -> vector<8x16xf32>
    %10 = tpu.iota {dimensions = array<i32: 1>} : vector<16x8xi32>
    %11 = vector.broadcast %5 : vector<16x1xi32> to vector<16x8xi32>
    %12 = arith.cmpi eq, %10, %11 : vector<16x8xi32>
    %13 = arith.extui %12 : vector<16x8xi1> to vector<16x8xi32>
    %14 = arith.sitofp %13 : vector<16x8xi32> to vector<16x8xf32>
    %15 = arith.truncf %14 : vector<16x8xf32> to vector<16x8xbf16>
    %16 = arith.truncf %9 : vector<8x16xf32> to vector<8x16xbf16>
    %cst_13 = arith.constant dense<0.000000e+00> : vector<16x16xf32>
    %17 = tpu.matmul %15, %16, %cst_13 {dimension_numbers = #tpu.dot_dimension_numbers<[1], [0], [0], [1], [0, 0, 1, 1], [], []>} : vector<16x8xbf16>, vector<8x16xbf16>, vector<16x16xf32> -> vector<16x16xf32>
    %c0_14 = arith.constant 0 : index
    %c0_15 = arith.constant 0 : index
    %18 = vector.load %arg8[%c0_14, %c0_15] : memref<4x16xbf16, #tpu.memory_space<vmem>>, vector<4x16xbf16>
    %cst_16 = arith.constant dense<0.000000e+00> : vector<16x16xf32>
    %19 = tpu.matmul %3, %18, %cst_16 {dimension_numbers = #tpu.dot_dimension_numbers<[1], [0], [0], [1], [0, 0, 1, 1], [], []>} : vector<16x4xbf16>, vector<4x16xbf16>, vector<16x16xf32> -> vector<16x16xf32>
    %20 = arith.addf %17, %19 : vector<16x16xf32>
    %c0_17 = arith.constant 0 : index
    %c0_18 = arith.constant 0 : index
    %21 = vector.load %arg9[%c0_17, %c0_18] : memref<1x16xf32, #tpu.memory_space<vmem>>, vector<1x16xf32>
    %22 = vector.broadcast %21 : vector<1x16xf32> to vector<16x16xf32>
    %23 = arith.addf %20, %22 : vector<16x16xf32>
    %cst_19 = arith.constant 0.000000e+00 : f32
    %24 = vector.broadcast %cst_19 : f32 to vector<16x16xf32>
    %25 = arith.maximumf %23, %24 : vector<16x16xf32>
    %26 = tpu.iota {dimensions = array<i32: 0>} : vector<8x16xi32>
    %27 = vector.broadcast %7 : vector<1x16xi32> to vector<8x16xi32>
    %28 = arith.cmpi eq, %26, %27 : vector<8x16xi32>
    %29 = arith.extui %28 : vector<8x16xi1> to vector<8x16xi32>
    %30 = arith.sitofp %29 : vector<8x16xi32> to vector<8x16xf32>
    %31 = arith.truncf %30 : vector<8x16xf32> to vector<8x16xbf16>
    %32 = arith.truncf %25 : vector<16x16xf32> to vector<16x16xbf16>
    %cst_20 = arith.constant dense<0.000000e+00> : vector<8x16xf32>
    %33 = tpu.matmul %31, %32, %cst_20 {dimension_numbers = #tpu.dot_dimension_numbers<[1], [0], [0], [1], [0, 0, 1, 1], [], []>} : vector<8x16xbf16>, vector<16x16xbf16>, vector<8x16xf32> -> vector<8x16xf32>
    %c0_21 = arith.constant 0 : index
    %c0_22 = arith.constant 0 : index
    %c0_23 = arith.constant 0 : index
    %34 = vector.load %arg6[%c0_21, %c0_22, %c0_23] : memref<1x8x1xf32, #tpu.memory_space<vmem>>, vector<1x8x1xf32>
    %35 = vector.shape_cast %34 : vector<1x8x1xf32> to vector<8x1xf32>
    %36 = vector.broadcast %35 : vector<8x1xf32> to vector<8x16xf32>
    %37 = arith.mulf %33, %36 : vector<8x16xf32>
    %c0_24 = arith.constant 0 : index
    %c0_25 = arith.constant 0 : index
    %38 = vector.load %arg10[%c0_24, %c0_25] : memref<8x32xbf16, #tpu.memory_space<vmem>>, vector<8x32xbf16>
    %cst_26 = arith.constant dense<0.000000e+00> : vector<8x32xf32>
    %39 = tpu.matmul %1, %38, %cst_26 {dimension_numbers = #tpu.dot_dimension_numbers<[1], [0], [0], [1], [0, 0, 1, 1], [], []>} : vector<8x8xbf16>, vector<8x32xbf16>, vector<8x32xf32> -> vector<8x32xf32>
    %40 = arith.truncf %37 : vector<8x16xf32> to vector<8x16xbf16>
    %c0_27 = arith.constant 0 : index
    %c0_28 = arith.constant 0 : index
    %41 = vector.load %arg11[%c0_27, %c0_28] : memref<16x32xbf16, #tpu.memory_space<vmem>>, vector<16x32xbf16>
    %cst_29 = arith.constant dense<0.000000e+00> : vector<8x32xf32>
    %42 = tpu.matmul %40, %41, %cst_29 {dimension_numbers = #tpu.dot_dimension_numbers<[1], [0], [0], [1], [0, 0, 1, 1], [], []>} : vector<8x16xbf16>, vector<16x32xbf16>, vector<8x32xf32> -> vector<8x32xf32>
    %43 = arith.addf %39, %42 : vector<8x32xf32>
    %c0_30 = arith.constant 0 : index
    %c0_31 = arith.constant 0 : index
    %44 = vector.load %arg12[%c0_30, %c0_31] : memref<1x32xf32, #tpu.memory_space<vmem>>, vector<1x32xf32>
    %45 = vector.broadcast %44 : vector<1x32xf32> to vector<8x32xf32>
    %46 = arith.addf %43, %45 : vector<8x32xf32>
    %cst_32 = arith.constant 0.000000e+00 : f32
    %47 = vector.broadcast %cst_32 : f32 to vector<8x32xf32>
    %48 = arith.maximumf %46, %47 : vector<8x32xf32>
    %c0_33 = arith.constant 0 : index
    %c0_34 = arith.constant 0 : index
    %c0_35 = arith.constant 0 : index
    %49 = vector.load %arg5[%c0_33, %c0_34, %c0_35] : memref<1x1x8xbf16, #tpu.memory_space<vmem>>, vector<1x1x8xbf16>
    %50 = vector.shape_cast %49 : vector<1x1x8xbf16> to vector<1x8xbf16>
    %51 = arith.truncf %48 : vector<8x32xf32> to vector<8x32xbf16>
    %cst_36 = arith.constant dense<0.000000e+00> : vector<1x32xf32>
    %52 = tpu.matmul %50, %51, %cst_36 {dimension_numbers = #tpu.dot_dimension_numbers<[1], [0], [0], [1], [0, 0, 1, 1], [], []>} : vector<1x8xbf16>, vector<8x32xbf16>, vector<1x32xf32> -> vector<1x32xf32>
    %c0_37 = arith.constant 0 : index
    %c0_38 = arith.constant 0 : index
    %c0_39 = arith.constant 0 : index
    %53 = vector.load %arg13[%c0_37, %c0_38, %c0_39] : memref<1x1x32xf32, #tpu.memory_space<vmem>>, vector<1x1x32xf32>
    %54 = vector.shape_cast %53 : vector<1x1x32xf32> to vector<1x32xf32>
    %55 = vector.shape_cast %52 : vector<1x32xf32> to vector<1x1x32xf32>
    tpu.vector_store %arg13[%c0_37, %c0_38, %c0_39], %55 {strides = array<i32>} : memref<1x1x32xf32, #tpu.memory_space<vmem>>, vector<1x1x32xf32>,
    return
  }
  func.func @transform_0(%arg0: i32) -> (i32, i32, i32) {
    %c0_i32 = arith.constant 0 : i32
    %c0_i32_0 = arith.constant 0 : i32
    %c0_i32_1 = arith.constant 0 : i32
    return %arg0, %c0_i32, %c0_i32_0 : i32, i32, i32
  }
  func.func @transform_1(%arg0: i32) -> (i32, i32, i32) {
    %c0_i32 = arith.constant 0 : i32
    %c0_i32_0 = arith.constant 0 : i32
    %c0_i32_1 = arith.constant 0 : i32
    return %arg0, %c0_i32, %c0_i32_0 : i32, i32, i32
  }
  func.func @transform_2(%arg0: i32) -> (i32, i32, i32) {
    %c0_i32 = arith.constant 0 : i32
    %c0_i32_0 = arith.constant 0 : i32
    %c0_i32_1 = arith.constant 0 : i32
    return %arg0, %c0_i32, %c0_i32_0 : i32, i32, i32
  }
  func.func @transform_3(%arg0: i32) -> (i32, i32, i32) {
    %c0_i32 = arith.constant 0 : i32
    %c0_i32_0 = arith.constant 0 : i32
    %c0_i32_1 = arith.constant 0 : i32
    return %arg0, %c0_i32, %c0_i32_0 : i32, i32, i32
  }
  func.func @transform_4(%arg0: i32) -> (i32, i32, i32) {
    %c0_i32 = arith.constant 0 : i32
    %c0_i32_0 = arith.constant 0 : i32
    %c0_i32_1 = arith.constant 0 : i32
    return %arg0, %c0_i32, %c0_i32_0 : i32, i32, i32
  }
  func.func @transform_5(%arg0: i32) -> (i32, i32, i32) {
    %c0_i32 = arith.constant 0 : i32
    %c0_i32_0 = arith.constant 0 : i32
    %c0_i32_1 = arith.constant 0 : i32
    return %arg0, %c0_i32, %c0_i32_0 : i32, i32, i32
  }
  func.func @transform_6(%arg0: i32) -> (i32, i32) {
    %c0_i32 = arith.constant 0 : i32
    %c0_i32_0 = arith.constant 0 : i32
    %c0_i32_1 = arith.constant 0 : i32
    return %c0_i32, %c0_i32_0 : i32, i32
  }
  func.func @transform_7(%arg0: i32) -> (i32, i32) {
    %c0_i32 = arith.constant 0 : i32
    %c0_i32_0 = arith.constant 0 : i32
    %c0_i32_1 = arith.constant 0 : i32
    return %c0_i32, %c0_i32_0 : i32, i32
  }
  func.func @transform_8(%arg0: i32) -> (i32, i32) {
    %c0_i32 = arith.constant 0 : i32
    %c0_i32_0 = arith.constant 0 : i32
    %c0_i32_1 = arith.constant 0 : i32
    return %c0_i32, %c0_i32_0 : i32, i32
  }
  func.func @transform_9(%arg0: i32) -> (i32, i32) {
    %c0_i32 = arith.constant 0 : i32
    %c0_i32_0 = arith.constant 0 : i32
    %c0_i32_1 = arith.constant 0 : i32
    return %c0_i32, %c0_i32_0 : i32, i32
  }
  func.func @transform_10(%arg0: i32) -> (i32, i32) {
    %c0_i32 = arith.constant 0 : i32
    %c0_i32_0 = arith.constant 0 : i32
    %c0_i32_1 = arith.constant 0 : i32
    return %c0_i32, %c0_i32_0 : i32, i32
  }
  func.func @transform_11(%arg0: i32) -> (i32, i32) {
    %c0_i32 = arith.constant 0 : i32
    %c0_i32_0 = arith.constant 0 : i32
    %c0_i32_1 = arith.constant 0 : i32
    return %c0_i32, %c0_i32_0 : i32, i32
  }
  func.func @transform_12(%arg0: i32) -> (i32, i32, i32) {
    %c0_i32 = arith.constant 0 : i32
    %c0_i32_0 = arith.constant 0 : i32
    %c0_i32_1 = arith.constant 0 : i32
    return %arg0, %c0_i32, %c0_i32_0 : i32, i32, i32
  }
}

</mosaic_0001>

<bundles_post_ra>
// kernel: gnn_policy_forward.1
= control target key start
LH: loop header
LB: loop body
LE: loop exit
PB: predicated region body
PF: predicated region fallthrough
CT: control target
= control target key end

     0   :  { %s1172_s21 = smov 0   ;;  %s1272_s0 = inlined_call_operand.vmem [shape: bf16[2,8,8], index: 0, kind: input, shape index: {}]   ;;  %s1273_s1 = inlined_call_operand.vmem [shape: bf16[2,16,4], index: 1, kind: input, shape index: {}]   ;;  %s1274_s2 = inlined_call_operand.vmem [shape: s32[2,16,1], index: 2, kind: input, shape index: {}]   ;;  %s1275_s3 = inlined_call_operand.vmem [shape: s32[2,1,16], index: 3, kind: input, shape index: {}]   ;;  %s1276_s4 = inlined_call_operand.vmem [shape: bf16[2,1,8], index: 4, kind: input, shape index: {}]   ;;  %s1277_s5 = inlined_call_operand.vmem [shape: f32[2,8,1], index: 5, kind: input, shape index: {}]   ;;  %s1278_s6 = inlined_call_operand.vmem [shape: bf16[8,16], index: 6, kind: input, shape index: {}]   ;;  %s1279_s7 = inlined_call_operand.vmem [shape: bf16[4,16], index: 7, kind: input, shape index: {}]   ;;  %s1280_s8 = inlined_call_operand.vmem [shape: f32[1,16], index: 8, kind: input, shape index: {}]   ;;  %s1281_s9 = inlined_call_operand.vmem [shape: bf16[8,32], index: 9, kind: input, shape index: {}]   ;;  %s1282_s10 = inlined_call_operand.vmem [shape: bf16[16,32], index: 10, kind: input, shape index: {}]   ;;  %s1283_s11 = inlined_call_operand.vmem [shape: f32[1,32], index: 11, kind: input, shape index: {}]   ;;  %s1284_s12 = inlined_call_operand.vmem [shape: f32[2,1,32], index: 12, kind: output, shape index: {}]  }
   0x1 LB: > { %s995_s22 = sadd.s32 4294967295, %s1102_s21   ;;  %p999_p0 = scmp.ge.s32.totalorder %s1102_s21, 1  ;;  %s1102_s21 = sphi %s1172_s21, %s22_s21  }
   0x2   : > { %p406_p1 = scmp.lt.s32.totalorder %s1102_s21, 3 }
   0x4   : > { %p407_p2 = pnand %p999_p0, %p406_p1 }
   0x5   : > { %v499_v0 = vld [vmem:[%s1278_s6] sm:$0xf] (!%p407_p2)  ;;  %vm504_vm0 = vcmask (!%p407_p2), 1043456   ;;  %p465_p3 = scmp.lt.s32.totalorder (!%p407_p2), %s995_s22, 1  ;;  %v1104_v1 = vmov (!%p407_p2), 0.0   ;;  %vm1105_vm1 = vmmov (!%p407_p2), 0   ;;  %v548_v11 = vlaneseq (!%p407_p2) }
   0x6   : > { %410 = sbr.rel (%p407_p2) target bundleno = 1115 (0x45b), region = 68  ;;  %1039 = vmatprep.subr.bf16.mxu0 (!%p407_p2), %v1104_v1  ;;  %v506_v2 = vsel (!%p407_p2), %vm504_vm0, %v499_v0, 0  ;;  %1041 = vmatprep.mubr.msk.bf16.mxu0 (!%p407_p2), %vm1105_vm1, %v1104_v1  ;;  %v1106_v3 = vmov (!%p407_p2), 0   ;;  %vm500_vm2 = vcmask (!%p407_p2), 64512   ;;  %v564_v7 = vld [vmem:[%s1279_s7] sm:$0x3] (!%p407_p2) }
   0x7   : > { %1040 = vmatpush3.bf16.msra.mxu0 (!%p407_p2), %v506_v2  ;;  %1092 = vset.pattern.permute.xlu0 (!%p407_p2), %v1106_v3  ;;  %vm574_vm3 = vcmask (!%p407_p2), 1041408   ;;  %vm570_vm4 = vcmask (!%p407_p2), 31744   ;;  %v549_v12 = vand.u32 (!%p407_p2), 127, %v548_v11  ;;  %v678_v28 = vshrl.u32 (!%p407_p2), %v548_v11, 7  ;;  %v1012_v30 = vld [vmem:[%s1280_s8] ss:$0 sm:$0xff] (!%p407_p2) }
   0x8   : > { %1045 = vmatprep.subr.bf16.mxu1 (!%p407_p2), %v1104_v1  ;;  %1047 = vmatprep.mubr.msk.bf16.mxu1 (!%p407_p2), %vm1105_vm1, %v1104_v1  ;;  %v576_v8 = vsel (!%p407_p2), %vm574_vm3, %v564_v7, 0  ;;  %v739_v43 = vld [vmem:[%s1281_s9] sm:$0xf] (!%p407_p2)  ;;  %vm688_vm8 = vcmask (!%p407_p2), 130048   ;;  %vm892_vm9 = vcmask (!%p407_p2), 253952  }
   0x9   : > { %1051 = vmatprep.subr.bf16.mxu0 (!%p407_p2), %v1104_v1  ;;  %1093 = vset.pattern.permute.xlu1 (!%p407_p2), %v1106_v3  ;;  %v793_v45 = vsel (!%p407_p2), %vm504_vm0, %v739_v43, 0  ;;  %v1095_v46 = vld [vmem:[%s1282_s10] sm:$0xff] (!%p407_p2)  }
   0xa   : > { %1046 = vmatpush3.bf16.msra.mxu1 (!%p407_p2), %v576_v8  ;;  %v1019_v59 = vld [vmem:[%s1283_s11] ss:$0 sm:$0xff] (!%p407_p2) }
   0xb   : > { %1057 = vmatprep.subr.bf16.mxu1 (!%p407_p2), %v1104_v1 }
   0xd   : > { %s1286_s22 = smov (!%p465_p3, %s995_s22), 1 }
   0xe   : > { %s1000_s25 = sshll.u32 %s1286_s22, 2  ;;  %s1024_s26 = sshll.u32 %s1286_s22, 4 }
   0xf   : > { %s468_s29 = scalar_lea.vmem %s1272_s0, %s1000_s25  ;;  %s478_s14 = scalar_lea.vmem %s1274_s2, %s1024_s26 }
  0x10   : > { %v1201_v4 = vld [vmem:[%s468_s29] sm:$0xf]  ;;  %v497_v6 = vld [vmem:[%s478_s14 + $0x8] sm:$0xff]  ;;  %s1023_s17 = sshll.u32 %s1286_s22, 3  ;;  %s481_s28 = scalar_lea.vmem %s1275_s3, %s1286_s22 }
  0x11   : > { %v496_v5 = vld [vmem:[%s478_s14] sm:$0xff]  ;;  %1042 = vmatmul.mubr.msk.bf16.vlgmr.msra.gmra.mrb[0].mxu0 %vm500_vm2, %v1201_v4  ;;  %s473_s20 = scalar_lea.vmem %s1273_s1, %s1023_s17  ;;  %s488_s25 = scalar_lea.vmem %s1277_s5, %s1023_s17 }
  0x12   : > { %551 = vperm.xlu0 %1092, %v496_v5   ;;  %1053 = vmatprep.mubr.msk.bf16.mxu0 %vm1105_vm1, %v1104_v1  ;;  %v1094_v9 = vld [vmem:[%s473_s20] sm:$0xff]   ;;  %s484_s23 = scalar_lea.vmem %s1276_s4, %s1286_s22  ;;  %s491_s26 = scalar_lea.vmem %s1284_s12, %s1286_s22 }
  0x13   : > { %1048 = vmatmul.mubr.msk.bf16.vlgmr.msra.gmra.mrb[0].mxu1 %vm570_vm4, %v1094_v9  ;;  %v732_v27 = vld [vmem:[%s488_s25] sm:$0xff] }
  0x14   : > { %1059 = vmatprep.mubr.msk.bf16.mxu1 %vm1105_vm1, %v1104_v1  ;;  %735 = vperm.xlu1 %1093, %v732_v27   ;;  %v1013_v31 = vld [vmem:[%s481_s28] ss:$0 sm:$0xff] }
  0x15   : > { %vm683_vm7 = vcmp.eq.s32.totalorder %v678_v28, %v1013_v31 }
  0x16   : > { %554 = vperm.xlu0 %1092, %v497_v6   ;;  %v1014_v39 = vsel %vm683_vm7, 1.0, %v1104_v1 }
  0x17   : > { %v686_v44 = vpack.c.bf16 %v1014_v39, %v1014_v39 }
  0x91   : > { %v552_v10 = vpop.permute.xlu0 %551 }
  0x92   : > { %vm556_vm5 = vcmp.eq.s32.totalorder %v549_v12, %v552_v10 }
  0x93   : > { %v1007_v17 = vsel %vm556_vm5, 1.0, %v1104_v1  ;;  %v736_v47 = vpop.permute.xlu1 %735 }
  0x95   : > { %v555_v13 = vpop.permute.xlu0 %554 }
  0x96   : > { %vm557_vm6 = vcmp.eq.s32.totalorder %v549_v12, %v555_v13 }
  0x97   : > { %v1008_v18 = vsel %vm557_vm6, 1.0, %v1104_v1 }
  0x98   : > { %v562_v22 = vpack.c.bf16 %v1008_v18, %v1007_v17 }
  0xe4   : > { %v542_v14 = vpop.f32.mrb[0].mxu0 }
  0xe5   : > { %v563_v15 = vpack.c.bf16 %v542_v14, %v542_v14  ;;  %v1043_v16 = vpop.f32.mrb[1].mxu0 }
  0xe6   : > { %v545_v19 = vpop.f32.mrb[2].mxu0  ;;  %v612_v23 = vpop.f32.mrb[0].mxu1 }
  0xe7   : > { %v623_v20 = vsel %vm504_vm0, %v563_v15, 0  ;;  %v1044_v21 = vpop.f32.mrb[3].mxu0  ;;  %v1049_v24 = vpop.f32.mrb[1].mxu1 }
  0xe8   : > { %1052 = vmatpush3.bf16.msra.mxu0 %v623_v20  ;;  %v615_v25 = vpop.f32.mrb[2].mxu1 }
  0xe9   : > { %1063 = vmatprep.subr.bf16.mxu0 %v1104_v1  ;;  %v1050_v26 = vpop.f32.mrb[3].mxu1 }
  0xeb   : > { %1054 = vmatmul.mubr.msk.bf16.vlgmr.msra.gmra.mrb[4].mxu0 %vm500_vm2, %v562_v22 }
  0xec   : > { %1065 = vmatprep.mubr.msk.bf16.mxu0 %vm1105_vm1, %v1104_v1  ;;  %1064 = vmatpush3.bf16.msra.mxu0 %v1095_v46 }
  0xed   : > { %1075 = vmatprep.subr.bf16.mxu0 %v1104_v1 }
 0x1be   : > { %v659_v29 = vpop.f32.mrb[4].mxu0 }
 0x1bf   : > { %v660_v32 = vadd.f32 %v659_v29, %v612_v23  ;;  %v1055_v33 = vpop.f32.mrb[5].mxu0 }
 0x1c0   : > { %v662_v34 = vpop.f32.mrb[6].mxu0 }
 0x1c1   : > { %v673_v35 = vadd.f32 %v1012_v30, %v660_v32  ;;  %v663_v36 = vadd.f32 %v662_v34, %v615_v25  ;;  %v1056_v37 = vpop.f32.mrb[7].mxu0 }
 0x1c3   : > { %v674_v38 = vadd.f32 %v1012_v30, %v663_v36  ;;  %v675_v40 = vmax.f32 %v673_v35, 0.0 }
 0x1c5   : > { %v676_v41 = vmax.f32 %v674_v38, 0.0 }
 0x1c7   : > { %v687_v42 = vpack.c.bf16 %v676_v41, %v675_v40 }
 0x1c9   : > { %1058 = vmatpush3.bf16.msra.mxu1 %v687_v42 }
 0x1ca   : > { %1069 = vmatprep.subr.bf16.mxu1 %v1104_v1 }
 0x1cc   : > { %1060 = vmatmul.mubr.msk.bf16.vlgmr.msra.gmra.mrb[4].mxu1 %vm688_vm8, %v686_v44 }
 0x1cd   : > { %1070 = vmatpush3.bf16.msra.mxu1 %v793_v45  ;;  %1071 = vmatprep.mubr.msk.bf16.mxu1 %vm1105_vm1, %v1104_v1 }
 0x1d4   : > { %1072 = vmatmul.mubr.msk.bf16.vlgmr.msra.gmra.mrb[8].mxu1 %vm500_vm2, %v1201_v4  ;;  %v844_v4 = vld [vmem:[%s484_s23] sm:$0x1] }
 0x29f   : > { %v726_v48 = vpop.f32.mrb[4].mxu1 }
 0x2a0   : > { %v738_v49 = vmul.f32 %v736_v47, %v726_v48  ;;  %v1061_v50 = vpop.f32.mrb[5].mxu1 }
 0x2a1   : > { %v729_v51 = vpop.f32.mrb[6].mxu1 }
 0x2a2   : > { %v740_v52 = vpack.c.bf16 %v738_v49, %v738_v49  ;;  %v1062_v53 = vpop.f32.mrb[7].mxu1 }
 0x2a4   : > { %1066 = vmatmul.mubr.msk.bf16.vlgmr.msra.gmra.mrb[8].mxu0 %vm688_vm8, %v740_v52 }
 0x2a5   : > { %1077 = vmatprep.mubr.msk.bf16.mxu0 %vm1105_vm1, %v1104_v1 }
 0x2a7   : > { %v829_v54 = vpop.f32.mrb[8].mxu1 }
 0x2a8   : > { %v1073_v55 = vpop.f32.mrb[9].mxu1 }
 0x2a9   : > { %v832_v56 = vpop.f32.mrb[10].mxu1 }
 0x2aa   : > { %v1074_v57 = vpop.f32.mrb[11].mxu1 }
 0x377   : > { %v786_v58 = vpop.f32.mrb[8].mxu0 }
 0x378   : > { %v830_v60 = vadd.f32 %v829_v54, %v786_v58  ;;  %v1067_v61 = vpop.f32.mrb[9].mxu0 }
 0x379   : > { %v789_v62 = vpop.f32.mrb[10].mxu0 }
 0x37a   : > { %v842_v63 = vadd.f32 %v1019_v59, %v830_v60  ;;  %v1068_v0 = vpop.f32.mrb[11].mxu0 }
 0x37c   : > { %v843_v2 = vmax.f32 %v842_v63, 0.0 }
 0x37e   : > { %v845_v3 = vpack.c.bf16 %v843_v2, %v843_v2 }
 0x380   : > { %v850_v1 = vsel %vm504_vm0, %v845_v3, 0 }
 0x381   : > { %1076 = vmatpush3.bf16.msra.mxu0 %v850_v1 }
 0x384   : > { %1078 = vmatmul.mubr.msk.bf16.vlgmr.msra.gmra.mrb[12].mxu0 %vm500_vm2, %v844_v4 }
 0x457   : > { %v886_v5 = vpop.f32.mrb[12].mxu0 }
 0x458   : > { %893 = vst.msk [vmem:[%s491_s26] sm:$0x1] %vm892_vm9, %v886_v5  ;;  %v1079_v6 = vpop.f32.mrb[13].mxu0 }
 0x459   : > { %v889_v7 = vpop.f32.mrb[14].mxu0 }
 0x45a   : > { %v1080_v8 = vpop.f32.mrb[15].mxu0 }
 0x45b PF: > { %s22_s21 = sadd.s32 1, %s1102_s21  }
 0x45c   : > { %p19_p4 = scmp.ge.s32.totalorder %s22_s21, 4  }
 0x45e   :  { %21 = sbr.rel (!%p19_p4) target bundleno = 1 (0x1), region = 113 }

</bundles_post_ra>
